<compile_context>
chip_gen: v6e
topology: v6e:2x2x1
jax: 0.10.0
libtpu: 0.0.40
codegen_flags: <defaults>
</compile_context>

<pallas_src>
import functools

import jax
import jax.numpy as jnp
from jax.experimental import pallas as pl
from jax.experimental.pallas import tpu as pltpu


def _round_up(x, m):
    return ((x + m - 1) // m) * m


def _device_kind():
    try:
        return jax.devices()[0].device_kind.lower()
    except Exception:
        return ""


def recog_kernel(x1_ref, x2_ref, w1_ref, b1_ref, w2_ref, b2_ref, o_ref, *scratch,
                 input_size, fuse_k):
    # x1_ref, x2_ref : (TILE_B, input_size)       one batch tile each (f32 in HBM)
    # w1_ref         : (2*input_size, H)          resident, compute dtype (bf16)
    # b1_ref         : (1, H) f32
    # w2_ref         : (1, H) f32                 fc2 weight as a row
    # b2_ref         : (1, 1) f32 in SMEM         scalar bias
    # o_ref          : (TILE_B, 1) f32
    # scratch        : optional (TILE_B, 2*input_size) VMEM concat buffer
    cdt = w1_ref.dtype

    if fuse_k:
        # v6e/v7x: one K=256 dot fills the 256-deep MXU; concat happens in VMEM.
        xcat_ref, = scratch
        xcat_ref[:, :input_size] = x1_ref[...].astype(cdt)
        xcat_ref[:, input_size:] = x2_ref[...].astype(cdt)
        h = jnp.dot(xcat_ref[...], w1_ref[...],
                    preferred_element_type=jnp.float32)
    else:
        # v5e: K=128 already fills the 4x128x128 MXU; keep the fused-concat identity
        # cat(x1,x2) @ W1 == x1 @ W1[:in] + x2 @ W1[in:].
        h = jnp.dot(x1_ref[...].astype(cdt), w1_ref[:input_size, :],
                    preferred_element_type=jnp.float32)
        h = h + jnp.dot(x2_ref[...].astype(cdt), w1_ref[input_size:, :],
                        preferred_element_type=jnp.float32)

    h = jnp.maximum(h + b1_ref[...], 0.0)                       # bias + ReLU on VPU

    # fc2 (H -> 1): VPU multiply + XLU row-reduce (keeps the MXU for the big matmul).
    y = jnp.sum(h * w2_ref[...], axis=-1, keepdims=True) + b2_ref[0, 0]  # (TILE_B, 1)
    o_ref[...] = y.astype(o_ref.dtype)


def recog_forward(x1, x2, w1, b1, w2, b2, *, tile_b=1024,
                  compute_dtype=jnp.bfloat16, fuse_k=None):
    """Forward pass of RecogModel.

    x1, x2 : (B, input_size) float32 (or bf16)
    w1     : (2*input_size, H)  -- pre-transposed (in, out) layout
    b1     : (H,)
    w2     : (H, 1)
    b2     : (1,)
    returns (B, 1) float32
    """
    B, input_size = x1.shape
    H = w1.shape[1]
    assert w1.shape[0] == 2 * input_size

    kind = _device_kind()
    if fuse_k is None:
        # v5e/v5p MXU is 128-deep -> K=128 already fills it; v6e/v7x are 256-deep.
        fuse_k = "v5" not in kind

    # Batch tile: multiple of 8 (sublane), capped by tile_b; grid = cdiv (no padding).
    tile_b = _round_up(max(tile_b, 128), 128)
    tile = min(tile_b, _round_up(max(B, 1), 8))
    num_blocks = pl.cdiv(B, tile)

    # v7x: shard the batch grid across the two TensorCores.
    use_core_parallel = (("v7" in kind or "7x" in kind)
                         and num_blocks >= 2 and num_blocks % 2 == 0)
    dim_sem = (pltpu.CORE_PARALLEL,) if use_core_parallel else (pltpu.PARALLEL,)

    w1c = w1.astype(compute_dtype)                 # small one-time cast (256 KiB)
    b1_2d = b1.reshape(1, H).astype(jnp.float32)
    w2_row = w2.reshape(1, H).astype(jnp.float32)
    b2_2d = b2.reshape(1, 1).astype(jnp.float32)

    scratch_shapes = []
    if fuse_k:
        scratch_shapes.append(pltpu.VMEM((tile, 2 * input_size), compute_dtype))

    kernel = functools.partial(recog_kernel, input_size=input_size, fuse_k=fuse_k)

    flops = 2 * B * (2 * input_size) * H + 4 * B * H
    bytes_accessed = (x1.size * x1.dtype.itemsize + x2.size * x2.dtype.itemsize
                      + w1c.size * w1c.dtype.itemsize + (2 * H + 1) * 4 + B * 4)

    out = pl.pallas_call(
        kernel,
        out_shape=jax.ShapeDtypeStruct((B, 1), jnp.float32),
        grid=(num_blocks,),
        in_specs=[
            pl.BlockSpec((tile, input_size), lambda i: (i, 0)),    # x1 tile
            pl.BlockSpec((tile, input_size), lambda i: (i, 0)),    # x2 tile
            pl.BlockSpec((2 * input_size, H), lambda i: (0, 0)),   # w1 (resident)
            pl.BlockSpec((1, H), lambda i: (0, 0)),                # b1
            pl.BlockSpec((1, H), lambda i: (0, 0)),                # w2 row
            pl.BlockSpec(memory_space=pltpu.MemorySpace.SMEM),     # b2 scalar
        ],
        out_specs=pl.BlockSpec((tile, 1), lambda i: (i, 0)),
        scratch_shapes=scratch_shapes,
        compiler_params=pltpu.CompilerParams(dimension_semantics=dim_sem),
        cost_estimate=pl.CostEstimate(flops=flops, transcendentals=0,
                                      bytes_accessed=bytes_accessed),
    )(x1, x2, w1c, b1_2d, w2_row, b2_2d)

    return out


def init_params(key, input_size=128, hidden=256):
    """Parameter init matching the PyTorch module's shapes (stored (in, out))."""
    k1, k2, k3, k4 = jax.random.split(key, 4)
    fan_in1 = input_size * 2
    fan_in2 = hidden
    bound1 = 1.0 / jnp.sqrt(fan_in1)
    bound2 = 1.0 / jnp.sqrt(fan_in2)
    w1 = jax.random.uniform(k1, (fan_in1, hidden), jnp.float32, -bound1, bound1)
    b1 = jax.random.uniform(k2, (hidden,), jnp.float32, -bound1, bound1)
    w2 = jax.random.uniform(k3, (fan_in2, 1), jnp.float32, -bound2, bound2)
    b2 = jax.random.uniform(k4, (1,), jnp.float32, -bound2, bound2)
    return w1, b1, w2, b2


def _reference(x1, x2, w1, b1, w2, b2):
    x = jnp.concatenate((x1, x2), axis=1)
    return jnp.maximum(x @ w1 + b1, 0.0) @ w2 + b2


if __name__ == "__main__":
    input_size = 128  # module default (fc1 expects 2*input_size = 256 features)

    key = jax.random.PRNGKey(0)
    kx1, kx2, kb1, kb2, kp = jax.random.split(key, 5)
    w1, b1, w2, b2 = init_params(kp, input_size)

    # Case 1: small batch, single block (device-auto variant), bf16 MXU path.
    batch = 8
    x1 = jax.random.normal(kx1, (batch, input_size), jnp.float32)
    x2 = jax.random.normal(kx2, (batch, input_size), jnp.float32)
    ref = _reference(x1, x2, w1, b1, w2, b2)

    out = jax.block_until_ready(recog_forward(x1, x2, w1, b1, w2, b2))
    assert out.shape == (batch, 1)
    assert jnp.allclose(out, ref, atol=3e-2, rtol=3e-2)

    # f32 compute-dtype flag for exact-numerics checks.
    out_f32 = jax.block_until_ready(
        recog_forward(x1, x2, w1, b1, w2, b2, compute_dtype=jnp.float32))
    assert jnp.allclose(out_f32, ref, atol=1e-3, rtol=1e-3)

    # Case 2: multi-tile grid with a partial tail block (no wrapper padding),
    # exercising both the fused-K (v6e/v7x) and split-K (v5e) kernel variants.
    batch2 = 300
    x1b = jax.random.normal(kb1, (batch2, input_size), jnp.float32)
    x2b = jax.random.normal(kb2, (batch2, input_size), jnp.float32)
    refb = _reference(x1b, x2b, w1, b1, w2, b2)
    for fk in (True, False):
        outb = jax.block_until_ready(
            recog_forward(x1b, x2b, w1, b1, w2, b2, tile_b=128, fuse_k=fk))
        assert outb.shape == (batch2, 1)
        assert jnp.allclose(outb, refb, atol=3e-2, rtol=3e-2)

    print("KERNEL_OK")
</pallas_src>

<mosaic_0001>
module attributes {stable_mosaic.version = 11 : i64} {
  func.func @recog_kernel(%arg0: i32, %arg1: memref<8x128xf32, #tpu.memory_space<vmem>>, %arg2: memref<8x128xf32, #tpu.memory_space<vmem>>, %arg3: memref<256x256xbf16, #tpu.memory_space<vmem>>, %arg4: memref<1x256xf32, #tpu.memory_space<vmem>>, %arg5: memref<1x256xf32, #tpu.memory_space<vmem>>, %arg6: memref<1x1xf32, #tpu.memory_space<smem>>, %arg7: memref<8x1xf32, #tpu.memory_space<vmem>>, %arg8: memref<8x256xbf16, #tpu.memory_space<vmem>>) attributes {dimension_semantics = [#tpu.dimension_semantics<parallel>], iteration_bounds = array<i64: 1>, scalar_prefetch = 0 : i64, scratch_operands = 1 : i64, tpu.core_type = #tpu.core_type<tc>, window_params = [{transform_indices = @transform_0, window_bounds = array<i64: 8, 128>}, {transform_indices = @transform_1, window_bounds = array<i64: 8, 128>}, {pipeline_mode = #tpu.pipeline_mode<synchronous>, transform_indices = @transform_2, window_bounds = array<i64: 256, 256>}, {pipeline_mode = #tpu.pipeline_mode<synchronous>, transform_indices = @transform_3, window_bounds = array<i64: 1, 256>}, {pipeline_mode = #tpu.pipeline_mode<synchronous>, transform_indices = @transform_4, window_bounds = array<i64: 1, 256>}, {transform_indices = @transform_5, window_bounds = array<i64: 1, 1>}, {transform_indices = @transform_6, window_bounds = array<i64: 8, 1>}]} {
    %c0 = arith.constant 0 : index
    %c0_0 = arith.constant 0 : index
    %0 = vector.load %arg1[%c0, %c0_0] : memref<8x128xf32, #tpu.memory_space<vmem>>, vector<8x128xf32>
    %1 = arith.truncf %0 : vector<8x128xf32> to vector<8x128xbf16>
    %c0_1 = arith.constant 0 : index
    %c0_2 = arith.constant 0 : index
    %2 = vector.load %arg8[%c0_1, %c0_2] : memref<8x256xbf16, #tpu.memory_space<vmem>>, vector<8x128xbf16>
    tpu.vector_store %arg8[%c0_1, %c0_2], %1 {strides = array<i32>} : memref<8x256xbf16, #tpu.memory_space<vmem>>, vector<8x128xbf16>,
    %c0_3 = arith.constant 0 : index
    %c0_4 = arith.constant 0 : index
    %3 = vector.load %arg2[%c0_3, %c0_4] : memref<8x128xf32, #tpu.memory_space<vmem>>, vector<8x128xf32>
    %4 = arith.truncf %3 : vector<8x128xf32> to vector<8x128xbf16>
    %c0_5 = arith.constant 0 : index
    %c128 = arith.constant 128 : index
    %5 = vector.load %arg8[%c0_5, %c128] : memref<8x256xbf16, #tpu.memory_space<vmem>>, vector<8x128xbf16>
    tpu.vector_store %arg8[%c0_5, %c128], %4 {strides = array<i32>} : memref<8x256xbf16, #tpu.memory_space<vmem>>, vector<8x128xbf16>,
    %c0_6 = arith.constant 0 : index
    %c0_7 = arith.constant 0 : index
    %6 = vector.load %arg8[%c0_6, %c0_7] : memref<8x256xbf16, #tpu.memory_space<vmem>>, vector<8x256xbf16>
    %c0_8 = arith.constant 0 : index
    %c0_9 = arith.constant 0 : index
    %7 = vector.load %arg3[%c0_8, %c0_9] : memref<256x256xbf16, #tpu.memory_space<vmem>>, vector<256x256xbf16>
    %cst = arith.constant dense<0.000000e+00> : vector<8x256xf32>
    %8 = tpu.matmul %6, %7, %cst {dimension_numbers = #tpu.dot_dimension_numbers<[1], [0], [0], [1], [0, 0, 1, 1], [], []>} : vector<8x256xbf16>, vector<256x256xbf16>, vector<8x256xf32> -> vector<8x256xf32>
    %c0_10 = arith.constant 0 : index
    %c0_11 = arith.constant 0 : index
    %9 = vector.load %arg4[%c0_10, %c0_11] : memref<1x256xf32, #tpu.memory_space<vmem>>, vector<1x256xf32>
    %10 = vector.broadcast %9 : vector<1x256xf32> to vector<8x256xf32>
    %11 = arith.addf %8, %10 : vector<8x256xf32>
    %cst_12 = arith.constant 0.000000e+00 : f32
    %12 = vector.broadcast %cst_12 : f32 to vector<8x256xf32>
    %13 = arith.maximumf %11, %12 : vector<8x256xf32>
    %c0_13 = arith.constant 0 : index
    %c0_14 = arith.constant 0 : index
    %14 = vector.load %arg5[%c0_13, %c0_14] : memref<1x256xf32, #tpu.memory_space<vmem>>, vector<1x256xf32>
    %15 = vector.broadcast %14 : vector<1x256xf32> to vector<8x256xf32>
    %16 = arith.mulf %13, %15 : vector<8x256xf32>
    %cst_15 = arith.constant dense<0.000000e+00> : vector<8xf32>
    %17 = vector.multi_reduction <add>, %16, %cst_15 [1] : vector<8x256xf32> to vector<8xf32>
    %18 = vector.shape_cast %17 : vector<8xf32> to vector<8x1xf32>
    %c0_16 = arith.constant 0 : index
    %c0_17 = arith.constant 0 : index
    %19 = memref.load %arg6[%c0_16, %c0_17] : memref<1x1xf32, #tpu.memory_space<smem>>
    %20 = vector.broadcast %19 : f32 to vector<8x1xf32>
    %21 = arith.addf %18, %20 : vector<8x1xf32>
    %c0_18 = arith.constant 0 : index
    %c0_19 = arith.constant 0 : index
    %22 = vector.load %arg7[%c0_18, %c0_19] : memref<8x1xf32, #tpu.memory_space<vmem>>, vector<8x1xf32>
    tpu.vector_store %arg7[%c0_18, %c0_19], %21 {strides = array<i32>} : memref<8x1xf32, #tpu.memory_space<vmem>>, vector<8x1xf32>,
    return
  }
  func.func @transform_0(%arg0: i32) -> (i32, i32) {
    %c0_i32 = arith.constant 0 : i32
    %c0_i32_0 = arith.constant 0 : i32
    return %arg0, %c0_i32 : i32, i32
  }
  func.func @transform_1(%arg0: i32) -> (i32, i32) {
    %c0_i32 = arith.constant 0 : i32
    %c0_i32_0 = arith.constant 0 : i32
    return %arg0, %c0_i32 : i32, i32
  }
  func.func @transform_2(%arg0: i32) -> (i32, i32) {
    %c0_i32 = arith.constant 0 : i32
    %c0_i32_0 = arith.constant 0 : i32
    %c0_i32_1 = arith.constant 0 : i32
    return %c0_i32, %c0_i32_0 : i32, i32
  }
  func.func @transform_3(%arg0: i32) -> (i32, i32) {
    %c0_i32 = arith.constant 0 : i32
    %c0_i32_0 = arith.constant 0 : i32
    %c0_i32_1 = arith.constant 0 : i32
    return %c0_i32, %c0_i32_0 : i32, i32
  }
  func.func @transform_4(%arg0: i32) -> (i32, i32) {
    %c0_i32 = arith.constant 0 : i32
    %c0_i32_0 = arith.constant 0 : i32
    %c0_i32_1 = arith.constant 0 : i32
    return %c0_i32, %c0_i32_0 : i32, i32
  }
  func.func @transform_5(%arg0: i32) -> (i32, i32) {
    %c0_i32 = arith.constant 0 : i32
    %c0_i32_0 = arith.constant 0 : i32
    %c0_i32_1 = arith.constant 0 : i32
    return %c0_i32, %c0_i32_0 : i32, i32
  }
  func.func @transform_6(%arg0: i32) -> (i32, i32) {
    %c0_i32 = arith.constant 0 : i32
    %c0_i32_0 = arith.constant 0 : i32
    return %arg0, %c0_i32 : i32, i32
  }
}

</mosaic_0001>

<bundles_post_ra>
// kernel: tpu_custom_call.1
= control target key start
LH: loop header
LB: loop body
LE: loop exit
PB: predicated region body
PF: predicated region fallthrough
CT: control target
= control target key end

     0   :  { %12 = vsyncpa [#allocation5], 0  ;;  %s569_s0 = inlined_call_operand.hbm [shape: f32[8,128], index: 0, kind: input, shape index: {}]   ;;  %s570_s1 = inlined_call_operand.hbm [shape: f32[8,128], index: 1, kind: input, shape index: {}]   ;;  %s571_s2 = inlined_call_operand.hbm [shape: bf16[256,256], index: 2, kind: input, shape index: {}]   ;;  %s572_s3 = inlined_call_operand.vmem [shape: f32[1,256], index: 3, kind: input, shape index: {}]   ;;  %s573_s4 = inlined_call_operand.vmem [shape: f32[1,256], index: 4, kind: input, shape index: {}]   ;;  %s574_s5 = inlined_call_operand.<no memory space> [shape: f32[1,1], index: 5, kind: input, shape index: {}]   ;;  %s575_s6 = inlined_call_operand.vmem [shape: f32[8,1], index: 6, kind: output, shape index: {}]  }
   0x1   :  { %13 = vsyncpa [#allocation7], 0  ;;  %s508_s21 = smov [#allocation6]   ;;  %s509_s23 = smov [#allocation4]  }
   0x2   :  { %s30_s22 = sshll.u32 %s508_s21, 4  ;;  %s20_s24 = sshll.u32 %s509_s23, 4  ;;  %s31_s22 = int_to_ptr.vmem [resolvable:$true] %s30_s22  ;;  %s21_s24 = int_to_ptr.vmem [resolvable:$true] %s20_s24 }
   0x3   :  { %s452_s25 = scalar_lea.vmem %s31_s22, 128  ;;  %p457_p1 = scmp.lt.s32.totalorder %s31_s22, %s31_s22 }
   0x4   :  { %p453_p0 = scmp.ne.s32.totalorder %s31_s22, %s452_s25  ;;  %p458_p2 = scmp.lt.s32.totalorder %s452_s25, %s452_s25 }
   0x6   :  { %p459_p3 = por %p458_p2, %p457_p1 }
   0x8   :  { %p460_p4 = pnand %p459_p3, %p453_p0 }
   0xa   :  { %463 = shalt.err (!%p460_p4)
}
   0xb   :  { %33 = dma.hbm_to_vmem [thread:$0]  %s570_s1, 128, %s31_s22, [#allocation7]  }
   0xc   :  { %s472_s28 = scalar_lea.vmem %s21_s24, 128  ;;  %p477_p6 = scmp.lt.s32.totalorder %s21_s24, %s21_s24 }
   0xd   :  { %p473_p5 = scmp.ne.s32.totalorder %s21_s24, %s472_s28  ;;  %p478_p7 = scmp.lt.s32.totalorder %s472_s28, %s472_s28 }
   0xf   :  { %p479_p8 = por %p478_p7, %p477_p6 }
  0x11   :  { %p480_p9 = pnand %p479_p8, %p473_p5 }
  0x13   :  { %483 = shalt.err (!%p480_p9)
}
  0x14   :  { %23 = dma.hbm_to_vmem [thread:$0]  %s569_s0, 128, %s21_s24, [#allocation5]  }
  0x15   :  { %s510_s7 = smov [#allocation8]  }
  0x16   :  { %s39_s8 = sshll.u32 %s510_s7, 4  ;;  %s40_s8 = int_to_ptr.vmem [resolvable:$true] %s39_s8 }
  0x17   :  { %s492_s9 = scalar_lea.vmem %s40_s8, 4096  ;;  %p497_p11 = scmp.lt.s32.totalorder %s40_s8, %s40_s8 }
  0x18   :  { %p493_p10 = scmp.ne.s32.totalorder %s40_s8, %s492_s9  ;;  %p498_p12 = scmp.lt.s32.totalorder %s492_s9, %s492_s9 }
  0x1a   :  { %p499_p13 = por %p498_p12, %p497_p11 }
  0x1c   :  { %p500_p0 = pnand %p499_p13, %p493_p10 }
  0x1e   :  { %503 = shalt.err (!%p500_p0)
}
  0x1f   :  { %s511_s1 = smov 128   ;;  %s512_s10 = smov 8  }
  0x20   :  { %45 = dma.hbm_to_vmem [thread:$0]  %s571_s2, 4096, %s40_s8, [#allocation7], %s511_s1, %s511_s1, %s512_s10  }
  0x21   :  { %504 = dma.done.wait [#allocation5], 128  }
  0x22   :  { %505 = vsyncadd [#allocation5], 4294967168 }
  0x23   :  { %506 = dma.done.wait [#allocation7], 4224  }
  0x24   :  { %507 = vsyncadd [#allocation7], 4294963072  ;;  %v396_v0 = vld [vmem:[#allocation8 + $0x74] ss:$8 sps:$4 sm:$0xff]   ;;  %v398_v1 = vld [vmem:[#allocation8 + $0x70] ss:$8 sps:$4 sm:$0xff]   ;;  %v102_v36 = vlaneseq  ;;  %v340_v57 = vstv %s574_s5 }
  0x25   :  { %279 = vmatprep.subr.bf16.mxu0 %v396_v0  ;;  %v399_v2 = vld [vmem:[#allocation8 + $0x64] ss:$8 sps:$4 sm:$0xff]   ;;  %v401_v3 = vld [vmem:[#allocation8 + $0x60] ss:$8 sps:$4 sm:$0xff]   ;;  %v402_v4 = vld [vmem:[#allocation8 + $0x54] ss:$8 sps:$4 sm:$0xff]  }
  0x26   :  { %280 = vmatpush1.bf16.msra.mxu0 %v398_v1  ;;  %v404_v5 = vld [vmem:[#allocation8 + $0x50] ss:$8 sps:$4 sm:$0xff]   ;;  %v405_v6 = vld [vmem:[#allocation8 + $0x44] ss:$8 sps:$4 sm:$0xff]   ;;  %v407_v7 = vld [vmem:[#allocation8 + $0x40] ss:$8 sps:$4 sm:$0xff]  }
  0x27   :  { %281 = vmatprep.subr.bf16.mxu0 %v399_v2  ;;  %v408_v8 = vld [vmem:[#allocation8 + $0x34] ss:$8 sps:$4 sm:$0xff]   ;;  %v410_v9 = vld [vmem:[#allocation8 + $0x30] ss:$8 sps:$4 sm:$0xff]   ;;  %v411_v10 = vld [vmem:[#allocation8 + $0x24] ss:$8 sps:$4 sm:$0xff]  }
  0x28   :  { %v413_v11 = vld [vmem:[#allocation8 + $0x20] ss:$8 sps:$4 sm:$0xff]   ;;  %v414_v12 = vld [vmem:[#allocation8 + $0x14] ss:$8 sps:$4 sm:$0xff]   ;;  %v416_v15 = vld [vmem:[#allocation8 + $0x10] ss:$8 sps:$4 sm:$0xff]  }
  0x29   :  { %v64_v13 = vld [vmem:[#allocation6] sm:$0xff]  ;;  %v417_v16 = vld [vmem:[#allocation8 + $0x4] ss:$8 sps:$4 sm:$0xff]   ;;  %v419_v17 = vld [vmem:[#allocation8] ss:$8 sps:$4 sm:$0xff]   ;;  %v103_v37 = vshrl.u32 %v102_v36, 7 }
  0x2a   :  { %282 = vmatpush1.bf16.msra.mxu0 %v401_v3  ;;  %v390_v14 = vpack.c.bf16 %v64_v13, %v64_v13  ;;  %v420_v18 = vld [vmem:[#allocation8 + $0xf4] ss:$8 sps:$4 sm:$0xff]   ;;  %v422_v19 = vld [vmem:[#allocation8 + $0xf0] ss:$8 sps:$4 sm:$0xff]   ;;  %v423_v20 = vld [vmem:[#allocation8 + $0xe4] ss:$8 sps:$4 sm:$0xff]  }
  0x2b   :  { %283 = vmatprep.subr.bf16.mxu0 %v402_v4  ;;  %v425_v21 = vld [vmem:[#allocation8 + $0xe0] ss:$8 sps:$4 sm:$0xff]   ;;  %v426_v22 = vld [vmem:[#allocation8 + $0xd4] ss:$8 sps:$4 sm:$0xff]   ;;  %v428_v23 = vld [vmem:[#allocation8 + $0xd0] ss:$8 sps:$4 sm:$0xff]  }
  0x2c   :  { %311 = vmatprep.mubr.bf16.mxu0 %v390_v14  ;;  %v429_v24 = vld [vmem:[#allocation8 + $0xc4] ss:$8 sps:$4 sm:$0xff]   ;;  %v431_v25 = vld [vmem:[#allocation8 + $0xc0] ss:$8 sps:$4 sm:$0xff]   ;;  %v432_v26 = vld [vmem:[#allocation8 + $0xb4] ss:$8 sps:$4 sm:$0xff]  }
  0x2d   :  { %v434_v27 = vld [vmem:[#allocation8 + $0xb0] ss:$8 sps:$4 sm:$0xff]   ;;  %v435_v28 = vld [vmem:[#allocation8 + $0xa4] ss:$8 sps:$4 sm:$0xff]   ;;  %v437_v29 = vld [vmem:[#allocation8 + $0xa0] ss:$8 sps:$4 sm:$0xff]  }
  0x2e   :  { %284 = vmatpush1.bf16.msra.mxu0 %v404_v5  ;;  %v438_v30 = vld [vmem:[#allocation8 + $0x94] ss:$8 sps:$4 sm:$0xff]   ;;  %v440_v31 = vld [vmem:[#allocation8 + $0x90] ss:$8 sps:$4 sm:$0xff]   ;;  %v441_v32 = vld [vmem:[#allocation8 + $0x84] ss:$8 sps:$4 sm:$0xff]  }
  0x2f   :  { %285 = vmatprep.subr.bf16.mxu0 %v405_v6  ;;  %v443_v33 = vld [vmem:[#allocation8 + $0x80] ss:$8 sps:$4 sm:$0xff]   ;;  %v61_v34 = vld [vmem:[#allocation4] sm:$0xff]  ;;  %v104_v38 = vsub.s32 0, %v103_v37  ;;  %v108_v40 = vsub.s32 1, %v103_v37  ;;  %vm342_vm0 = vcmask 7168  }
  0x30   :  { %v389_v35 = vpack.c.bf16 %v61_v34, %v61_v34  ;;  %v100_v39 = vld [vmem:[%s572_s3] sm:$0x3] }
  0x31   :  { %v105_v41 = vrot.slane %v100_v39, %v104_v38  ;;  %v109_v42 = vrot.slane %v100_v39, %v108_v40  ;;  %v322_v44 = vld [vmem:[%s573_s4] sm:$0x3] }
  0x32   :  { %286 = vmatpush1.bf16.msra.mxu0 %v407_v7  ;;  %v327_v49 = vrot.slane %v322_v44, %v104_v38  ;;  %v331_v50 = vrot.slane %v322_v44, %v108_v40 }
  0x33   :  { %287 = vmatprep.subr.bf16.mxu0 %v408_v8 }
  0x36   :  { %288 = vmatpush1.bf16.msra.mxu0 %v410_v9 }
  0x37   :  { %289 = vmatprep.subr.bf16.mxu0 %v411_v10 }
  0x3a   :  { %290 = vmatpush1.bf16.msra.mxu0 %v413_v11 }
  0x3b   :  { %291 = vmatprep.subr.bf16.mxu0 %v414_v12 }
  0x3e   :  { %292 = vmatpush1.bf16.msra.mxu0 %v416_v15 }
  0x3f   :  { %293 = vmatprep.subr.bf16.mxu0 %v417_v16 }
  0x42   :  { %294 = vmatpush1.bf16.msra.mxu0 %v419_v17 }
  0x43   :  { %295 = vmatprep.subr.bf16.mxu0 %v420_v18 }
  0x46   :  { %296 = vmatpush2.bf16.msra.mxu0 %v422_v19 }
  0x47   :  { %297 = vmatprep.subr.bf16.mxu0 %v423_v20 }
  0x4a   :  { %298 = vmatpush2.bf16.msra.mxu0 %v425_v21 }
  0x4b   :  { %299 = vmatprep.subr.bf16.mxu0 %v426_v22 }
  0x4e   :  { %300 = vmatpush2.bf16.msra.mxu0 %v428_v23 }
  0x4f   :  { %301 = vmatprep.subr.bf16.mxu0 %v429_v24 }
  0x52   :  { %302 = vmatpush2.bf16.msra.mxu0 %v431_v25 }
  0x53   :  { %303 = vmatprep.subr.bf16.mxu0 %v432_v26 }
  0x56   :  { %304 = vmatpush2.bf16.msra.mxu0 %v434_v27 }
  0x57   :  { %305 = vmatprep.subr.bf16.mxu0 %v435_v28 }
  0x5a   :  { %306 = vmatpush2.bf16.msra.mxu0 %v437_v29 }
  0x5b   :  { %307 = vmatprep.subr.bf16.mxu0 %v438_v30 }
  0x5e   :  { %308 = vmatpush2.bf16.msra.mxu0 %v440_v31 }
  0x5f   :  { %309 = vmatprep.subr.bf16.mxu0 %v441_v32 }
  0x62   :  { %310 = vmatpush2.bf16.msra.mxu0 %v443_v33 }
  0x65   :  { %312 = vmatmul.mubr.bf16.vlgmr.msra.gmra.mxu0 %v389_v35 }
 0x125   :  { %v313_v43 = vpop.f32.mrf.mxu0 }
 0x126   :  { %v314_v45 = vadd.f32 %v313_v43, %v105_v41 }
 0x127   :  { %v315_v46 = vpop.f32.mrf.mxu0 }
 0x128   :  { %v320_v47 = vmax.f32 %v314_v45, 0.0  ;;  %v316_v48 = vadd.f32 %v315_v46, %v109_v42 }
 0x129   :  { %v317_v51 = vpop.f32.mrf.mxu0 }
 0x12a   :  { %v321_v52 = vmax.f32 %v316_v48, 0.0  ;;  %v334_v54 = vmul.f32 %v327_v49, %v320_v47 }
 0x12b   :  { %v318_v53 = vpop.f32.mrf.mxu0 }
 0x12c   :  { %v335_v55 = vmul.f32 %v331_v50, %v321_v52 }
 0x12e   :  { %v336_v56 = vadd.f32 %v335_v55, %v334_v54 }
 0x130   :  { %337 = vadd.xlane.f32.xlu0 %v336_v56 }
 0x1b9   :  { %v338_v58 = vpop.xlane.xlu0 %337 }
 0x1ba   :  { %v341_v59 = vadd.f32 %v340_v57, %v338_v58 }
 0x1bc   :  { %343 = vst.msk [vmem:[%s575_s6] sm:$0xff] %vm342_vm0, %v341_v59 }
 0x1bd   :  { %348 = vsyncpa [#allocation5], 1 }
 0x1be   :  { %349 = vsyncpa [#allocation7], 1 }

</bundles_post_ra>
